<compile_context>
chip_gen: v7x
topology: tpu7x:2x2x1
jax: 0.10.0
libtpu: 0.0.40
codegen_flags: <defaults>
</compile_context>

<pallas_src>
import jax
import jax.numpy as jnp
from jax.experimental import pallas as pl
from jax.experimental.pallas import tpu as pltpu


_MAX_DMA_CHUNKS = 8  # concurrent HBM->HBM DMA streams


def _ceil_div(a: int, b: int) -> int:
    return -(-a // b)


def _sublane_align(dtype) -> int:
    # Sub-32-bit dtypes pack along sublanes: f32 -> 8, bf16 -> 16, int8/fp8 -> 32.
    itemsize = jnp.dtype(dtype).itemsize
    return max(8, (8 * 4) // max(1, itemsize))


def _row_splits(rows: int, align: int, max_chunks: int):
    """Static split of [0, rows) into <= max_chunks contiguous, align-multiple ranges."""
    n = max(1, min(max_chunks, _ceil_div(rows, align)))
    chunk = _ceil_div(_ceil_div(rows, n), align) * align
    splits = [0]
    while splits[-1] + chunk < rows:
        splits.append(splits[-1] + chunk)
    splits.append(rows)
    return splits


def _make_dma_copy_kernel(row_splits):
    n_chunks = len(row_splits) - 1

    def kernel(r_ref, o_ref, sems):
        # Issue every chunked HBM->HBM copy first so the DMA engines stream
        # concurrently, then wait on all of them.  All slice bounds are static.
        for c in range(n_chunks):
            lo, hi = row_splits[c], row_splits[c + 1]
            pltpu.make_async_copy(
                r_ref.at[pl.ds(lo, hi - lo)],
                o_ref.at[pl.ds(lo, hi - lo)],
                sems.at[c],
            ).start()
        for c in range(n_chunks):
            lo, hi = row_splits[c], row_splits[c + 1]
            pltpu.make_async_copy(
                r_ref.at[pl.ds(lo, hi - lo)],
                o_ref.at[pl.ds(lo, hi - lo)],
                sems.at[c],
            ).wait()

    return kernel, n_chunks


def relevance_propagation_flatten(a: jax.Array, r: jax.Array) -> jax.Array:
    """LRP for a Flatten layer: redistribute relevance back to a's shape.

    a: activation tensor of shape (N, C, H, W)  (NCHW)
    r: relevance tensor of shape (N, C*H*W)     (output side of Flatten)
    returns: relevance with shape a.shape, same values as r.
    """
    assert r.size == a.size, "relevance and activation must have equal size"
    total = r.size
    itemsize = jnp.dtype(r.dtype).itemsize

    # Lane-dense 2D view of the contiguous relevance buffer: widest 128-multiple
    # lane divisor -> longest contiguous DMA bursts.
    lane = None
    for cand in (8192, 4096, 2048, 1024, 512, 256, 128):
        if total % cand == 0:
            lane = cand
            break
    if lane is None:
        # Rare ragged case: fall back to the natural (N, flat) view.  The
        # DMA-only kernel has no (8,128) block constraint, so this stays legal.
        lane = total // a.shape[0]
    rows = total // lane
    r2 = r.reshape(rows, lane)

    align = _sublane_align(r.dtype)
    splits = _row_splits(rows, align, _MAX_DMA_CHUNKS)
    kernel, n_chunks = _make_dma_copy_kernel(splits)

    out = pl.pallas_call(
        kernel,
        out_shape=jax.ShapeDtypeStruct((rows, lane), r.dtype),
        in_specs=[pl.BlockSpec(memory_space=pl.ANY)],
        out_specs=pl.BlockSpec(memory_space=pl.ANY),
        scratch_shapes=[pltpu.SemaphoreType.DMA((n_chunks,))],
        cost_estimate=pl.CostEstimate(
            flops=0,
            transcendentals=0,
            bytes_accessed=2 * total * itemsize,
        ),
    )(r2)

    # Pure metadata reshape back to the activation's shape.
    return out.reshape(a.shape)


if __name__ == "__main__":
    key = jax.random.PRNGKey(0)
    ka, kr = jax.random.split(key)

    # Small shapes consistent with the module: a is NCHW, r is its flattened form.
    N, C, H, W = 2, 4, 16, 16
    a = jax.random.normal(ka, (N, C, H, W), dtype=jnp.float32)
    r = jax.random.normal(kr, (N, C * H * W), dtype=jnp.float32)

    out = relevance_propagation_flatten(a, r)
    out = jax.block_until_ready(out)

    # Reference: exactly r.view(a.shape)
    ref = r.reshape(a.shape)
    assert out.shape == a.shape
    assert out.dtype == r.dtype
    assert bool(jnp.array_equal(out, ref))

    print("KERNEL_OK")
</pallas_src>

<mosaic_0001>
module attributes {stable_mosaic.version = 11 : i64} {
  func.func @kernel(%arg0: memref<1x2048xf32, #tpu.memory_space<any>>, %arg1: memref<1x2048xf32, #tpu.memory_space<any>>, %arg2: memref<1x!tpu.dma_semaphore, #tpu.memory_space<semaphore_mem>>) attributes {dimension_semantics = [], scalar_prefetch = 0 : i64, scratch_operands = 1 : i64, tpu.core_type = #tpu.core_type<tc>} {
    %c0_i32 = arith.constant 0 : i32
    %c0_i32_0 = arith.constant 0 : i32
    %c0_i32_1 = arith.constant 0 : i32
    %0 = tpu.memref_slice %arg0[%c0_i32_0, %c0_i32_1] : memref<1x2048xf32, #tpu.memory_space<any>> -> memref<1x2048xf32, #tpu.memory_space<any>>
    %c0_i32_2 = arith.constant 0 : i32
    %c0_i32_3 = arith.constant 0 : i32
    %1 = tpu.memref_slice %arg1[%c0_i32_2, %c0_i32_3] : memref<1x2048xf32, #tpu.memory_space<any>> -> memref<1x2048xf32, #tpu.memory_space<any>>
    %2 = tpu.memref_slice %arg2[%c0_i32] : memref<1x!tpu.dma_semaphore, #tpu.memory_space<semaphore_mem>> -> memref<1x!tpu.dma_semaphore, #tpu.memory_space<semaphore_mem>>
    %3 = tpu.memref_squeeze %2 : memref<1x!tpu.dma_semaphore, #tpu.memory_space<semaphore_mem>> -> memref<!tpu.dma_semaphore, #tpu.memory_space<semaphore_mem>>
    tpu.enqueue_dma source(%0 : memref<1x2048xf32, #tpu.memory_space<any>>) target(%1 : memref<1x2048xf32, #tpu.memory_space<any>>) target_semaphore(%3 : memref<!tpu.dma_semaphore, #tpu.memory_space<semaphore_mem>>)
    %c0_i32_4 = arith.constant 0 : i32
    %c0_i32_5 = arith.constant 0 : i32
    %c0_i32_6 = arith.constant 0 : i32
    %4 = tpu.memref_slice %arg0[%c0_i32_5, %c0_i32_6] : memref<1x2048xf32, #tpu.memory_space<any>> -> memref<1x2048xf32, #tpu.memory_space<any>>
    %c0_i32_7 = arith.constant 0 : i32
    %c0_i32_8 = arith.constant 0 : i32
    %5 = tpu.memref_slice %arg1[%c0_i32_7, %c0_i32_8] : memref<1x2048xf32, #tpu.memory_space<any>> -> memref<1x2048xf32, #tpu.memory_space<any>>
    %6 = tpu.memref_slice %arg2[%c0_i32_4] : memref<1x!tpu.dma_semaphore, #tpu.memory_space<semaphore_mem>> -> memref<1x!tpu.dma_semaphore, #tpu.memory_space<semaphore_mem>>
    %7 = tpu.memref_squeeze %6 : memref<1x!tpu.dma_semaphore, #tpu.memory_space<semaphore_mem>> -> memref<!tpu.dma_semaphore, #tpu.memory_space<semaphore_mem>>
    tpu.wait_dma2 semaphore(%7 : memref<!tpu.dma_semaphore, #tpu.memory_space<semaphore_mem>>) src(%4 : memref<1x2048xf32, #tpu.memory_space<any>>) dst(%5 : memref<1x2048xf32, #tpu.memory_space<any>>)
    return
  }
}

</mosaic_0001>

<bundles_post_ra>
// kernel: tpu_custom_call.1
= control target key start
LH: loop header
LB: loop body
LE: loop exit
PB: predicated region body
PF: predicated region fallthrough
CT: control target
= control target key end

     0   :  { %s34_s6 = smov [#allocation2]   ;;  %s35_s7 = smov [#allocation3]   ;;  %s53_s0 = inlined_call_operand.hbm [shape: f32[1,2048], index: 0, kind: input, shape index: {}]   ;;  %s54_s1 = inlined_call_operand.hbm [shape: f32[1,2048], index: 1, kind: output, shape index: {}]  }
   0x1   :  { %s36_s8 = smov 0  }
   0x2   :  { %18 = dma.general %s53_s0, 256, %s54_s1, %s34_s6, %s35_s7, [#allocation4], %s36_s8, 0  }
   0x3   :  { %32 = dma.done.wait [#allocation2], 256 }
   0x4   :  { %33 = vsyncadd [#allocation2], 4294967040 }
   0x5   :  { %22 = vsyncmov [#allocation2] }
   0x8   :  { %s23_s13 = vpop.sfrf %22 }
   0x9   :  { %p28_p0 = scmp.ne.s32.totalorder %s23_s13, 0 }
   0xb   :  { %27 = shalt.err (%p28_p0)  }

</bundles_post_ra>
